<compile_context>
chip_gen: v5e
topology: v5e:2x2
jax: 0.10.0
libtpu: 0.0.40
codegen_flags: <defaults>
</compile_context>

<pallas_src>
import jax
import jax.numpy as jnp
from jax.experimental import pallas as pl
from jax.experimental.pallas import tpu as pltpu


def mlp_kernel(p_ref, x_ref, o_ref):
    # p_ref (SMEM, (4,4) f32), packed parameters:
    #   p[0:3, 0:3] = W1 stored (in, out)      p[3, 0:3] = b1
    #   p[0:3, 3]   = W2 column (in,)          p[3, 3]   = b2
    # x_ref (VMEM): (3, N)  -- features on sublanes, batch on lanes
    # o_ref (VMEM): (1, N)  -- lane-dense output
    x = x_ref[...]                     # (3, N)
    x0 = x[0:1, :]
    x1 = x[1:2, :]
    x2 = x[2:3, :]

    # Layer 1: Linear(3, 3) + ReLU, unrolled over the 3 hidden units (VPU only)
    h = []
    for j in range(3):
        hj = (x0 * p_ref[0, j]
              + x1 * p_ref[1, j]
              + x2 * p_ref[2, j]
              + p_ref[3, j])
        h.append(jnp.maximum(hj, 0.0))

    # Layer 2: Linear(3, 1) + ReLU  (3 mul-adds + bias)
    out = (h[0] * p_ref[0, 3]
           + h[1] * p_ref[1, 3]
           + h[2] * p_ref[2, 3]
           + p_ref[3, 3])
    o_ref[...] = jnp.maximum(out, 0.0)


def mlp_forward(x, packed):
    n = x.shape[0]
    x_t = x.T                                        # (3, N): batch on lanes
    out_1n = pl.pallas_call(
        mlp_kernel,
        out_shape=jax.ShapeDtypeStruct((1, n), jnp.float32),
        in_specs=[
            pl.BlockSpec(memory_space=pltpu.MemorySpace.SMEM),   # packed params
            pl.BlockSpec(memory_space=pltpu.MemorySpace.VMEM),   # x (3, N)
        ],
        out_specs=pl.BlockSpec(memory_space=pltpu.MemorySpace.VMEM),
    )(packed, x_t)
    return out_1n.T                                  # (N, 1) like the torch module


def init_params(key):
    # Deterministic init mimicking torch.nn.Linear default
    # (uniform in [-1/sqrt(fan_in), 1/sqrt(fan_in)]).  Weights stored (in, out).
    k1, k2, k3, k4 = jax.random.split(key, 4)
    bound = 1.0 / jnp.sqrt(3.0)
    w1 = jax.random.uniform(k1, (3, 3), jnp.float32, -bound, bound)
    b1 = jax.random.uniform(k2, (3,), jnp.float32, -bound, bound)
    w2 = jax.random.uniform(k3, (3, 1), jnp.float32, -bound, bound)
    b2 = jax.random.uniform(k4, (1,), jnp.float32, -bound, bound)
    return w1, b1, w2, b2


def pack_params(w1, b1, w2, b2):
    packed = jnp.zeros((4, 4), jnp.float32)
    packed = packed.at[0:3, 0:3].set(w1)
    packed = packed.at[3, 0:3].set(b1)
    packed = packed.at[0:3, 3].set(w2[:, 0])
    packed = packed.at[3, 3].set(b2[0])
    return packed


if __name__ == "__main__":
    # XOR-style truth-table input from the original script: shape (8, 3)
    x = jnp.array(
        [
            [0.0, 0.0, 0.0],
            [0.0, 0.0, 1.0],
            [0.0, 1.0, 0.0],
            [0.0, 1.0, 1.0],
            [1.0, 0.0, 0.0],
            [1.0, 0.0, 1.0],
            [1.0, 1.0, 0.0],
            [1.0, 1.0, 1.0],
        ],
        dtype=jnp.float32,
    )

    w1, b1, w2, b2 = init_params(jax.random.PRNGKey(0))
    packed = pack_params(w1, b1, w2, b2)

    out = jax.block_until_ready(mlp_forward(x, packed))

    # Pure-JAX reference check
    ref = jnp.maximum(jnp.maximum(x @ w1 + b1, 0.0) @ w2 + b2[None, :], 0.0)
    assert out.shape == (8, 1)
    assert jnp.allclose(out, ref, atol=1e-5, rtol=1e-5), "mismatch vs reference"

    print("KERNEL_OK")
</pallas_src>

<mosaic_0001>
module attributes {stable_mosaic.version = 11 : i64} {
  func.func @mlp_kernel(%arg0: memref<4x4xf32, #tpu.memory_space<smem>>, %arg1: memref<3x8xf32, #tpu.memory_space<vmem>>, %arg2: memref<1x8xf32, #tpu.memory_space<vmem>>) attributes {dimension_semantics = [], scalar_prefetch = 0 : i64, scratch_operands = 0 : i64, tpu.core_type = #tpu.core_type<tc>} {
    %c0 = arith.constant 0 : index
    %c0_0 = arith.constant 0 : index
    %0 = vector.load %arg1[%c0, %c0_0] : memref<3x8xf32, #tpu.memory_space<vmem>>, vector<3x8xf32>
    %1 = vector.extract_strided_slice %0 {offsets = [0, 0], sizes = [1, 8], strides = [1, 1]} : vector<3x8xf32> to vector<1x8xf32>
    %2 = vector.extract_strided_slice %0 {offsets = [1, 0], sizes = [1, 8], strides = [1, 1]} : vector<3x8xf32> to vector<1x8xf32>
    %3 = vector.extract_strided_slice %0 {offsets = [2, 0], sizes = [1, 8], strides = [1, 1]} : vector<3x8xf32> to vector<1x8xf32>
    %c0_1 = arith.constant 0 : index
    %c0_2 = arith.constant 0 : index
    %4 = memref.load %arg0[%c0_1, %c0_2] : memref<4x4xf32, #tpu.memory_space<smem>>
    %5 = vector.broadcast %4 : f32 to vector<1x8xf32>
    %6 = arith.mulf %1, %5 : vector<1x8xf32>
    %c1 = arith.constant 1 : index
    %c0_3 = arith.constant 0 : index
    %7 = memref.load %arg0[%c1, %c0_3] : memref<4x4xf32, #tpu.memory_space<smem>>
    %8 = vector.broadcast %7 : f32 to vector<1x8xf32>
    %9 = arith.mulf %2, %8 : vector<1x8xf32>
    %10 = arith.addf %6, %9 : vector<1x8xf32>
    %c2 = arith.constant 2 : index
    %c0_4 = arith.constant 0 : index
    %11 = memref.load %arg0[%c2, %c0_4] : memref<4x4xf32, #tpu.memory_space<smem>>
    %12 = vector.broadcast %11 : f32 to vector<1x8xf32>
    %13 = arith.mulf %3, %12 : vector<1x8xf32>
    %14 = arith.addf %10, %13 : vector<1x8xf32>
    %c3 = arith.constant 3 : index
    %c0_5 = arith.constant 0 : index
    %15 = memref.load %arg0[%c3, %c0_5] : memref<4x4xf32, #tpu.memory_space<smem>>
    %16 = vector.broadcast %15 : f32 to vector<1x8xf32>
    %17 = arith.addf %14, %16 : vector<1x8xf32>
    %cst = arith.constant 0.000000e+00 : f32
    %18 = vector.broadcast %cst : f32 to vector<1x8xf32>
    %19 = arith.maximumf %17, %18 : vector<1x8xf32>
    %c0_6 = arith.constant 0 : index
    %c1_7 = arith.constant 1 : index
    %20 = memref.load %arg0[%c0_6, %c1_7] : memref<4x4xf32, #tpu.memory_space<smem>>
    %21 = vector.broadcast %20 : f32 to vector<1x8xf32>
    %22 = arith.mulf %1, %21 : vector<1x8xf32>
    %c1_8 = arith.constant 1 : index
    %c1_9 = arith.constant 1 : index
    %23 = memref.load %arg0[%c1_8, %c1_9] : memref<4x4xf32, #tpu.memory_space<smem>>
    %24 = vector.broadcast %23 : f32 to vector<1x8xf32>
    %25 = arith.mulf %2, %24 : vector<1x8xf32>
    %26 = arith.addf %22, %25 : vector<1x8xf32>
    %c2_10 = arith.constant 2 : index
    %c1_11 = arith.constant 1 : index
    %27 = memref.load %arg0[%c2_10, %c1_11] : memref<4x4xf32, #tpu.memory_space<smem>>
    %28 = vector.broadcast %27 : f32 to vector<1x8xf32>
    %29 = arith.mulf %3, %28 : vector<1x8xf32>
    %30 = arith.addf %26, %29 : vector<1x8xf32>
    %c3_12 = arith.constant 3 : index
    %c1_13 = arith.constant 1 : index
    %31 = memref.load %arg0[%c3_12, %c1_13] : memref<4x4xf32, #tpu.memory_space<smem>>
    %32 = vector.broadcast %31 : f32 to vector<1x8xf32>
    %33 = arith.addf %30, %32 : vector<1x8xf32>
    %cst_14 = arith.constant 0.000000e+00 : f32
    %34 = vector.broadcast %cst_14 : f32 to vector<1x8xf32>
    %35 = arith.maximumf %33, %34 : vector<1x8xf32>
    %c0_15 = arith.constant 0 : index
    %c2_16 = arith.constant 2 : index
    %36 = memref.load %arg0[%c0_15, %c2_16] : memref<4x4xf32, #tpu.memory_space<smem>>
    %37 = vector.broadcast %36 : f32 to vector<1x8xf32>
    %38 = arith.mulf %1, %37 : vector<1x8xf32>
    %c1_17 = arith.constant 1 : index
    %c2_18 = arith.constant 2 : index
    %39 = memref.load %arg0[%c1_17, %c2_18] : memref<4x4xf32, #tpu.memory_space<smem>>
    %40 = vector.broadcast %39 : f32 to vector<1x8xf32>
    %41 = arith.mulf %2, %40 : vector<1x8xf32>
    %42 = arith.addf %38, %41 : vector<1x8xf32>
    %c2_19 = arith.constant 2 : index
    %c2_20 = arith.constant 2 : index
    %43 = memref.load %arg0[%c2_19, %c2_20] : memref<4x4xf32, #tpu.memory_space<smem>>
    %44 = vector.broadcast %43 : f32 to vector<1x8xf32>
    %45 = arith.mulf %3, %44 : vector<1x8xf32>
    %46 = arith.addf %42, %45 : vector<1x8xf32>
    %c3_21 = arith.constant 3 : index
    %c2_22 = arith.constant 2 : index
    %47 = memref.load %arg0[%c3_21, %c2_22] : memref<4x4xf32, #tpu.memory_space<smem>>
    %48 = vector.broadcast %47 : f32 to vector<1x8xf32>
    %49 = arith.addf %46, %48 : vector<1x8xf32>
    %cst_23 = arith.constant 0.000000e+00 : f32
    %50 = vector.broadcast %cst_23 : f32 to vector<1x8xf32>
    %51 = arith.maximumf %49, %50 : vector<1x8xf32>
    %c0_24 = arith.constant 0 : index
    %c3_25 = arith.constant 3 : index
    %52 = memref.load %arg0[%c0_24, %c3_25] : memref<4x4xf32, #tpu.memory_space<smem>>
    %53 = vector.broadcast %52 : f32 to vector<1x8xf32>
    %54 = arith.mulf %19, %53 : vector<1x8xf32>
    %c1_26 = arith.constant 1 : index
    %c3_27 = arith.constant 3 : index
    %55 = memref.load %arg0[%c1_26, %c3_27] : memref<4x4xf32, #tpu.memory_space<smem>>
    %56 = vector.broadcast %55 : f32 to vector<1x8xf32>
    %57 = arith.mulf %35, %56 : vector<1x8xf32>
    %58 = arith.addf %54, %57 : vector<1x8xf32>
    %c2_28 = arith.constant 2 : index
    %c3_29 = arith.constant 3 : index
    %59 = memref.load %arg0[%c2_28, %c3_29] : memref<4x4xf32, #tpu.memory_space<smem>>
    %60 = vector.broadcast %59 : f32 to vector<1x8xf32>
    %61 = arith.mulf %51, %60 : vector<1x8xf32>
    %62 = arith.addf %58, %61 : vector<1x8xf32>
    %c3_30 = arith.constant 3 : index
    %c3_31 = arith.constant 3 : index
    %63 = memref.load %arg0[%c3_30, %c3_31] : memref<4x4xf32, #tpu.memory_space<smem>>
    %64 = vector.broadcast %63 : f32 to vector<1x8xf32>
    %65 = arith.addf %62, %64 : vector<1x8xf32>
    %cst_32 = arith.constant 0.000000e+00 : f32
    %66 = vector.broadcast %cst_32 : f32 to vector<1x8xf32>
    %67 = arith.maximumf %65, %66 : vector<1x8xf32>
    %c0_33 = arith.constant 0 : index
    %c0_34 = arith.constant 0 : index
    %68 = vector.load %arg2[%c0_33, %c0_34] : memref<1x8xf32, #tpu.memory_space<vmem>>, vector<1x8xf32>
    tpu.vector_store %arg2[%c0_33, %c0_34], %67 {strides = array<i32>} : memref<1x8xf32, #tpu.memory_space<vmem>>, vector<1x8xf32>,
    return
  }
}

</mosaic_0001>

<bundles_post_ra>
// kernel: tpu_custom_call.1
= control target key start
LH: loop header
LB: loop body
LE: loop exit
PB: predicated region body
PF: predicated region fallthrough
CT: control target
= control target key end

     0   :  { %7 = vsyncpa [#allocation5], 0  ;;  %s258_s0 = inlined_call_operand.hbm [shape: f32[4,4], index: 0, kind: input, shape index: {}]   ;;  %s259_s1 = inlined_call_operand.hbm [shape: f32[3,8], index: 1, kind: input, shape index: {}]   ;;  %s260_s2 = inlined_call_operand.hbm [shape: f32[1,8], index: 2, kind: output, shape index: {}]  }
   0x1   :  { %8 = vsyncpa [#allocation3], 0 }
   0x2   :  { %9 = vsyncpa [#allocation4], 0  ;;  %s15_s11 = sshll.u32 %s258_s0, 4  ;;  %s24_s14 = sshll.u32 %s259_s1, 4  ;;  %s16_s11 = int_to_ptr.hbm [resolvable:$true] %s15_s11  ;;  %s25_s14 = int_to_ptr.hbm [resolvable:$true] %s24_s14 }
   0x3   :  { %s222_s15 = smov [#allocation2]   ;;  %s223_s16 = smov [#allocation6]  }
   0x4   :  { %18 = dma.hbm_to_smem %s16_s11, 64, %s222_s15, [#allocation5]  }
   0x5   :  { %s26_s17 = sshll.u32 %s223_s16, 4  ;;  %s27_s17 = int_to_ptr.vmem [resolvable:$true] %s26_s17 }
   0x6   :  { %29 = dma.hbm_to_vmem [thread:$0]  %s25_s14, 64, %s27_s17, [#allocation3]  }
   0x7   :  { %216 = dma.done.wait [#allocation5], 64  }
   0x8   :  { %217 = vsyncadd [#allocation5], 4294967232 }
   0x9   :  { %218 = dma.done.wait [#allocation3], 64  }
   0xa   :  { %219 = vsyncadd [#allocation3], 4294967232 }
   0xb   :  { %38 = sfence }
   0xc   :  { %s40_s18 = sld [smem:[#allocation2]]  ;;  %v39_v0 = vld [vmem:[#allocation6] sm:$0x7]  ;;  %s224_s4 = smov [#allocation7]   ;;  %vm118_vm0 = vcmask 57344  }
   0xd   :  { %s138_s19 = sld [smem:[#allocation2 + $0x80]]  ;;  %s125_s5 = sshll.u32 %s224_s4, 4  ;;  %s126_s5 = int_to_ptr.vmem [resolvable:$true] %s125_s5 }
   0xe   :  { %s139_s0 = sld [smem:[#allocation2 + $0x100]]  ;;  %s127_s8 = sshll.u32 %s260_s2, 4  ;;  %s128_s8 = int_to_ptr.hbm [resolvable:$true] %s127_s8 }
   0xf   :  { %s246_s20 = sld [smem:[#allocation2 + $0x180]] }
  0x10   :  { %s141_s21 = sld [smem:[#allocation2 + $0x1]] }
  0x11   :  { %s142_s1 = sld [smem:[#allocation2 + $0x81]] }
  0x12   :  { %v41_v1 = vstv %s40_s18  ;;  %s143_s22 = sld [smem:[#allocation2 + $0x101]] }
  0x13   :  { %v44_v2 = vstv %s138_s19  ;;  %s248_s23 = sld [smem:[#allocation2 + $0x181]]  ;;  %v42_v3 = vmul.f32 %v41_v1, %v39_v0 }
  0x14   :  { %v45_v4 = vmul.f32 %v44_v2, %v39_v0  ;;  %v51_v5 = vstv %s139_s0  ;;  %s145_s24 = sld [smem:[#allocation2 + $0x2]] }
  0x15   :  { %v52_v6 = vmul.f32 %v51_v5, %v39_v0  ;;  %s146_s25 = sld [smem:[#allocation2 + $0x82]]  ;;  %v58_v15 = vstv %s246_s20 }
  0x16   :  { %v47_v7 = vrot.slane %v45_v4, 1  ;;  %v62_v8 = vstv %s141_s21  ;;  %s147_s26 = sld [smem:[#allocation2 + $0x102]] }
  0x17   :  { %v54_v9 = vrot.slane %v52_v6, 2  ;;  %v65_v10 = vstv %s142_s1  ;;  %s250_s27 = sld [smem:[#allocation2 + $0x182]]  ;;  %v63_v12 = vmul.f32 %v62_v8, %v39_v0 }
  0x18   :  { %v49_v11 = vadd.f32 %v47_v7, %v42_v3  ;;  %v66_v13 = vmul.f32 %v65_v10, %v39_v0  ;;  %v72_v14 = vstv %s143_s22  ;;  %s149_s28 = sld [smem:[#allocation2 + $0x3]] }
  0x19   :  { %v73_v16 = vmul.f32 %v72_v14, %v39_v0  ;;  %s150_s29 = sld [smem:[#allocation2 + $0x83]]  ;;  %v79_v27 = vstv %s248_s23 }
  0x1a   :  { %v56_v17 = vadd.f32 %v54_v9, %v49_v11  ;;  %v68_v18 = vrot.slane %v66_v13, 1  ;;  %v83_v19 = vstv %s145_s24  ;;  %s151_s30 = sld [smem:[#allocation2 + $0x103]] }
  0x1b   :  { %v75_v20 = vrot.slane %v73_v16, 2  ;;  %v84_v21 = vmul.f32 %v83_v19, %v39_v0  ;;  %v86_v22 = vstv %s146_s25  ;;  %s152_s3 = sld [smem:[#allocation2 + $0x183]] }
  0x1c   :  { %v59_v23 = vadd.f32 %v58_v15, %v56_v17  ;;  %v70_v24 = vadd.f32 %v68_v18, %v63_v12  ;;  %v87_v25 = vmul.f32 %v86_v22, %v39_v0  ;;  %v93_v26 = vstv %s147_s26 }
  0x1d   :  { %v94_v28 = vmul.f32 %v93_v26, %v39_v0  ;;  %v100_v36 = vstv %s250_s27 }
  0x1e   :  { %v60_v29 = vmax.f32 %v59_v23, 0.0  ;;  %v77_v30 = vadd.f32 %v75_v20, %v70_v24  ;;  %v89_v31 = vrot.slane %v87_v25, 1  ;;  %v104_v33 = vstv %s149_s28 }
  0x1f   :  { %v96_v32 = vrot.slane %v94_v28, 2  ;;  %v107_v37 = vstv %s150_s29 }
  0x20   :  { %v80_v34 = vadd.f32 %v79_v27, %v77_v30  ;;  %v91_v35 = vadd.f32 %v89_v31, %v84_v21  ;;  %v105_v40 = vmul.f32 %v104_v33, %v60_v29  ;;  %v111_v43 = vstv %s151_s30 }
  0x21   :  { %v115_v47 = vstv %s152_s3 }
  0x22   :  { %v81_v38 = vmax.f32 %v80_v34, 0.0  ;;  %v98_v39 = vadd.f32 %v96_v32, %v91_v35 }
  0x24   :  { %v101_v41 = vadd.f32 %v100_v36, %v98_v39  ;;  %v108_v42 = vmul.f32 %v107_v37, %v81_v38 }
  0x26   :  { %v102_v44 = vmax.f32 %v101_v41, 0.0  ;;  %v109_v45 = vadd.f32 %v108_v42, %v105_v40 }
  0x28   :  { %v112_v46 = vmul.f32 %v111_v43, %v102_v44 }
  0x2a   :  { %v113_v48 = vadd.f32 %v112_v46, %v109_v45 }
  0x2c   :  { %v116_v49 = vadd.f32 %v115_v47, %v113_v48 }
  0x2e   :  { %v117_v50 = vmax.f32 %v116_v49, 0.0 }
  0x30   :  { %119 = vst.msk [vmem:[#allocation7] sm:$0x1] %vm118_vm0, %v117_v50 }
  0x31   :  { %130 = dma.vmem_to_hbm [thread:$0]  %s126_s5, 16, %s128_s8, [#allocation4]  }
  0x32   :  { %220 = dma.done.wait [#allocation4], 16  }
  0x33   :  { %221 = vsyncadd [#allocation4], 4294967280 }
  0x34   :  { %135 = vsyncpa [#allocation3], 1 }
  0x35   :  { %136 = vsyncpa [#allocation4], 1 }
  0x36   :  { %137 = vsyncpa [#allocation5], 1 }

</bundles_post_ra>
